<compile_context>
chip_gen: v5e
topology: v5e:2x2
jax: 0.10.0
libtpu: 0.0.40
codegen_flags: <defaults>
</compile_context>

<pallas_src>
import jax
import jax.numpy as jnp
import numpy as np
from jax.experimental import pallas as pl
from jax.experimental.pallas import tpu as pltpu


def _conv_relu_kernel(p_ref, w_ref, b_ref, o_ref):
    # p_ref : (K, H*W)    im2col patch for one image (K = KH*KW*CIN), lane-dense
    # w_ref : (COUT, K)   reshaped conv weights
    # b_ref : (COUT, 1)   bias, broadcasts over lanes
    # o_ref : (COUT, H*W) lane-dense output (already NCHW per image)
    acc = jnp.dot(w_ref[...], p_ref[...], preferred_element_type=jnp.float32)
    o_ref[...] = jnp.maximum(acc + b_ref[...], 0.0)   # fn == ReLU


def conv_relu_pallas(x_nchw, weight_oihw, bias, kernel_size):
    """Same-padded Conv2d (groups=1) + ReLU, matching nn.Conv2d + nn.ReLU."""
    N, CIN, H, W = x_nchw.shape
    COUT = weight_oihw.shape[0]
    KH = KW = kernel_size
    pad = kernel_size // 2
    K = KH * KW * CIN
    HW = H * W

    # ---- wrapper-side layout plumbing (plain JAX) -------------------------
    # Zero-pad spatially, then im2col into (N, K, H*W) with K ordered
    # (kh, kw, cin).  This presents the kernel with one lane-dense slab per
    # image in the final matmul layout (no in-kernel relayouts).
    x_pad = jnp.pad(x_nchw, ((0, 0), (0, 0), (pad, pad), (pad, pad)))
    taps = [x_pad[:, :, kh:kh + H, kw:kw + W]
            for kh in range(KH) for kw in range(KW)]      # each (N, CIN, H, W)
    patch = jnp.stack(taps, axis=1).reshape(N, K, HW)     # (N, K, H*W)

    # Weights OIHW -> (COUT, KH, KW, CIN) -> (COUT, K), matching patch K order.
    w_mat = jnp.transpose(weight_oihw, (0, 2, 3, 1)).reshape(COUT, K)
    b_col = bias.reshape(COUT, 1)

    out = pl.pallas_call(
        _conv_relu_kernel,
        out_shape=jax.ShapeDtypeStruct((N, COUT, HW), jnp.float32),
        grid_spec=pltpu.PrefetchScalarGridSpec(
            num_scalar_prefetch=0,
            grid=(N,),
            in_specs=[
                # one im2col'd image per grid step, batch dim squeezed
                pl.BlockSpec((pl.Squeezed(), K, HW), lambda n: (n, 0, 0)),
                # weights / bias resident every step
                pl.BlockSpec((COUT, K), lambda n: (0, 0)),
                pl.BlockSpec((COUT, 1), lambda n: (0, 0)),
            ],
            out_specs=pl.BlockSpec((pl.Squeezed(), COUT, HW),
                                   lambda n: (n, 0, 0)),
        ),
        compiler_params=pltpu.CompilerParams(
            # batch axis parallel: shards across v7x's 2 TCs, no-op on v5e/v6e
            dimension_semantics=("parallel",)
        ),
    )(patch, w_mat, b_col)

    # (N, COUT, H*W) is already NCHW — only a free reshape remains.
    return out.reshape(N, COUT, H, W)


def conv_relu_reference(x_nchw, weight_oihw, bias, kernel_size):
    pad = kernel_size // 2
    y = jax.lax.conv_general_dilated(
        x_nchw, weight_oihw,
        window_strides=(1, 1),
        padding=((pad, pad), (pad, pad)),
        dimension_numbers=("NCHW", "OIHW", "NCHW"),
    )
    y = y + bias.reshape(1, -1, 1, 1)
    return jnp.maximum(y, 0.0)


if __name__ == "__main__":
    # Conv(in_channels=4, out_channels=8, kernel_size=3, fn=nn.ReLU())
    N, CIN, H, W = 2, 4, 16, 16
    COUT, K = 8, 3

    key = jax.random.PRNGKey(0)
    kx, kw, kb = jax.random.split(key, 3)

    x = jax.random.normal(kx, (N, CIN, H, W), dtype=jnp.float32)
    # Deterministic synthetic params (nn.Conv2d shapes: (O, I, K, K) and (O,)).
    fan_in = CIN * K * K
    bound = 1.0 / np.sqrt(fan_in)
    weight = jax.random.uniform(kw, (COUT, CIN, K, K), jnp.float32, -bound, bound)
    bias = jax.random.uniform(kb, (COUT,), jnp.float32, -bound, bound)

    y = conv_relu_pallas(x, weight, bias, K)
    y = jax.block_until_ready(y)

    y_ref = conv_relu_reference(x, weight, bias, K)
    np.testing.assert_allclose(np.asarray(y), np.asarray(y_ref),
                               rtol=1e-5, atol=1e-5)
    print("KERNEL_OK")
</pallas_src>

<mosaic_0001>
module attributes {stable_mosaic.version = 11 : i64} {
  func.func @_conv_relu_kernel(%arg0: i32, %arg1: memref<1x36x256xf32, #tpu.memory_space<vmem>>, %arg2: memref<8x36xf32, #tpu.memory_space<vmem>>, %arg3: memref<8x1xf32, #tpu.memory_space<vmem>>, %arg4: memref<1x8x256xf32, #tpu.memory_space<vmem>>) attributes {dimension_semantics = [#tpu.dimension_semantics<parallel>], iteration_bounds = array<i64: 2>, scalar_prefetch = 0 : i64, scratch_operands = 0 : i64, tpu.core_type = #tpu.core_type<tc>, window_params = [{transform_indices = @transform_0, window_bounds = array<i64: 1, 36, 256>}, {pipeline_mode = #tpu.pipeline_mode<synchronous>, transform_indices = @transform_1, window_bounds = array<i64: 8, 36>}, {pipeline_mode = #tpu.pipeline_mode<synchronous>, transform_indices = @transform_2, window_bounds = array<i64: 8, 1>}, {transform_indices = @transform_3, window_bounds = array<i64: 1, 8, 256>}]} {
    %c0 = arith.constant 0 : index
    %c0_0 = arith.constant 0 : index
    %0 = vector.load %arg2[%c0, %c0_0] : memref<8x36xf32, #tpu.memory_space<vmem>>, vector<8x36xf32>
    %c0_1 = arith.constant 0 : index
    %c0_2 = arith.constant 0 : index
    %c0_3 = arith.constant 0 : index
    %1 = vector.load %arg1[%c0_1, %c0_2, %c0_3] : memref<1x36x256xf32, #tpu.memory_space<vmem>>, vector<1x36x256xf32>
    %2 = vector.shape_cast %1 : vector<1x36x256xf32> to vector<36x256xf32>
    %cst = arith.constant dense<0.000000e+00> : vector<8x256xf32>
    %3 = tpu.matmul %0, %2, %cst {dimension_numbers = #tpu.dot_dimension_numbers<[1], [0], [0], [1], [0, 0, 1, 1], [], []>} : vector<8x36xf32>, vector<36x256xf32>, vector<8x256xf32> -> vector<8x256xf32>
    %c0_4 = arith.constant 0 : index
    %c0_5 = arith.constant 0 : index
    %4 = vector.load %arg3[%c0_4, %c0_5] : memref<8x1xf32, #tpu.memory_space<vmem>>, vector<8x1xf32>
    %5 = vector.broadcast %4 : vector<8x1xf32> to vector<8x256xf32>
    %6 = arith.addf %3, %5 : vector<8x256xf32>
    %cst_6 = arith.constant 0.000000e+00 : f32
    %7 = vector.broadcast %cst_6 : f32 to vector<8x256xf32>
    %8 = arith.maximumf %6, %7 : vector<8x256xf32>
    %c0_7 = arith.constant 0 : index
    %c0_8 = arith.constant 0 : index
    %c0_9 = arith.constant 0 : index
    %9 = vector.load %arg4[%c0_7, %c0_8, %c0_9] : memref<1x8x256xf32, #tpu.memory_space<vmem>>, vector<1x8x256xf32>
    %10 = vector.shape_cast %9 : vector<1x8x256xf32> to vector<8x256xf32>
    %11 = vector.shape_cast %8 : vector<8x256xf32> to vector<1x8x256xf32>
    tpu.vector_store %arg4[%c0_7, %c0_8, %c0_9], %11 {strides = array<i32>} : memref<1x8x256xf32, #tpu.memory_space<vmem>>, vector<1x8x256xf32>,
    return
  }
  func.func @transform_0(%arg0: i32) -> (i32, i32, i32) {
    %c0_i32 = arith.constant 0 : i32
    %c0_i32_0 = arith.constant 0 : i32
    %c0_i32_1 = arith.constant 0 : i32
    return %arg0, %c0_i32, %c0_i32_0 : i32, i32, i32
  }
  func.func @transform_1(%arg0: i32) -> (i32, i32) {
    %c0_i32 = arith.constant 0 : i32
    %c0_i32_0 = arith.constant 0 : i32
    %c0_i32_1 = arith.constant 0 : i32
    return %c0_i32, %c0_i32_0 : i32, i32
  }
  func.func @transform_2(%arg0: i32) -> (i32, i32) {
    %c0_i32 = arith.constant 0 : i32
    %c0_i32_0 = arith.constant 0 : i32
    %c0_i32_1 = arith.constant 0 : i32
    return %c0_i32, %c0_i32_0 : i32, i32
  }
  func.func @transform_3(%arg0: i32) -> (i32, i32, i32) {
    %c0_i32 = arith.constant 0 : i32
    %c0_i32_0 = arith.constant 0 : i32
    %c0_i32_1 = arith.constant 0 : i32
    return %arg0, %c0_i32, %c0_i32_0 : i32, i32, i32
  }
}

</mosaic_0001>

<bundles_post_ra>
// kernel: tpu_custom_call.1
= control target key start
LH: loop header
LB: loop body
LE: loop exit
PB: predicated region body
PF: predicated region fallthrough
CT: control target
= control target key end

     0   :  { %8 = vsyncpa [#allocation3], 0  ;;  %s551_s0 = inlined_call_operand.vmem [shape: f32[2,36,256], index: 0, kind: input, shape index: {}]   ;;  %s552_s1 = inlined_call_operand.vmem [shape: f32[8,36], index: 1, kind: input, shape index: {}]   ;;  %s553_s2 = inlined_call_operand.vmem [shape: f32[8,1], index: 2, kind: input, shape index: {}]   ;;  %s554_s3 = inlined_call_operand.hbm [shape: f32[2,8,256], index: 3, kind: output, shape index: {}]  }
   0x1   :  { %10 = vsyncpa [#allocation3 + $0x1], 0  ;;  %s460_s12 = smov 0   ;;  %s462_s13 = smov 0  }
   0x2   :  { %s464_s14 = smov 0   ;;  %s466_s15 = smov 0  }
   0x3 LB: > { %s481_s16 = sadd.s32 4294967295, %s437_s15   ;;  %s317_s17 = sadd.s32 4294967294, %s437_s15   ;;  %s437_s15 = sphi %s466_s15, %s560_s15   ;;  %s433_s14 = sphi %s464_s14, %s559_s14   ;;  %s429_s13 = sphi %s462_s13, %s558_s13   ;;  %s425_s12 = sphi %s460_s12, %s557_s12  }
   0x4   : > { %s485_s18 = sadd.s32 1, %s437_s15   ;;  %s91_s19 = sadd.s32 1, %s433_s14 }
   0x5   : > { %s88_s20 = ssub.s32 %s437_s15, %s485_s18  ;;  %p101_p0 = scmp.ne.s32.totalorder %s433_s14, %s429_s13 }
   0x6   : > { %p89_p1 = scmp.eq.s32.totalorder %s88_s20, 0  ;;  %p102_p2 = scmp.eq.s32.totalorder %s481_s16, 1 }
   0x7   : > { %p107_p3 = scmp.ne.s32.totalorder %s429_s13, %s425_s12  ;;  %p108_p4 = scmp.eq.s32.totalorder %s317_s17, 1 }
   0x8   : > { %s496_s21 = scalar_select %p89_p1, %s433_s14, %s91_s19  }
   0x9   : > { %p498_p5 = por %p102_p2, %p101_p0  ;;  %p502_p6 = por %p108_p4, %p107_p3 }
   0xa   : > { %p320_p7 = scmp.ge.s32.totalorder %s437_s15, 1  ;;  %p140_p8 = scmp.lt.s32.totalorder %s437_s15, 3 }
   0xc   : > { %p141_p9 = pnand %p320_p7, %p140_p8 }
   0xd   : > { %p164_p10 = scmp.lt.s32.totalorder (!%p141_p9), %s481_s16, 1  ;;  %s161_s6 = sand.u32 (!%p141_p9), 1, %s429_s13  }
   0xe   : > { %144 = sbr.rel (%p141_p9) target bundleno = 168 (0xa8), region = 32  ;;  %s321_s7 = sshll.u32 (!%p141_p9), %s161_s6, 4 }
   0xf   : > { %s332_s8 = sshll.u32 (!%p141_p9), %s481_s16, 4  ;;  %s163_s17 = scalar_lea.vmem (!%p141_p9), [#allocation2], %s321_s7 }
  0x10   : > { %s253_s11 = scalar_lea.hbm (!%p141_p9), %s554_s3, %s332_s8  ;;  %s255_s19 = sshll.u32 (!%p141_p9), %s163_s17, 4  ;;  %s256_s19 = int_to_ptr.vmem [resolvable:$true] %s255_s19 }
  0x11   : > { %s257_s20 = sshll.u32 (!%p141_p9), %s253_s11, 4  ;;  %s395_s28 = scalar_lea.hbm (!%p141_p9), %s554_s3, 32  ;;  %s258_s20 = int_to_ptr.hbm [resolvable:$true] %s257_s20 }
  0x12   : > { %s389_s24 = sshra.s32 (!%p141_p9), %s258_s20, 4  ;;  %s390_s24 = int_to_ptr.hbm [resolvable:$true] %s389_s24 }
  0x13   : > { %v180_v0 = vld [vmem:[%s553_s2] sm:$0xff]  ;;  %v439_v1 = vmov 0   ;;  %s165_s26 = scalar_select %p164_p10, %s481_s16, 1  ;;  %vm190_vm0 = vcmask 1043456   ;;  %vm186_vm1 = vcmask 293888  }
  0x14   : > { %374 = vset.pattern.permute.xlu0 %v439_v1  ;;  %v169_v12 = vld [vmem:[%s552_s1] sm:$0xff]  ;;  %s242_s16 = scalar_lea.sflag [#allocation3], %s161_s6  ;;  %s391_s25 = scalar_lea.hbm %s390_s24, 16 }
  0x15   : > { %183 = vperm.xlu0 %374, %v180_v0   ;;  %s333_s27 = smul.u32 80, %s165_s26  ;;  %p392_p11 = scmp.ne.s32.totalorder %s390_s24, %s391_s25 }
  0x16   : > { %p396_p0 = scmp.lt.s32.totalorder %s390_s24, %s554_s3  ;;  %p397_p1 = scmp.lt.s32.totalorder %s395_s28, %s391_s25 }
  0x17   : > { %s168_s30 = scalar_lea.vmem %s551_s0, %s333_s27  ;;  %p393_p12 = pnand %p392_p11, %p498_p5 }
  0x18   : > { %v178_v2 = vld [vmem:[%s168_s30 + $0x40] sm:$0xf]  ;;  %v179_v3 = vld [vmem:[%s168_s30 + $0x48] sm:$0xf]  ;;  %v176_v4 = vld [vmem:[%s168_s30 + $0x30] sm:$0xff]  ;;  %p398_p2 = por %p397_p1, %p396_p0 }
  0x19   : > { %323 = vmatpush.msk.msra.mxu0 %vm190_vm0, %v178_v2  ;;  %325 = vmatpush.msk.msra.mxu1 %vm190_vm0, %v179_v3  ;;  %v177_v5 = vld [vmem:[%s168_s30 + $0x38] sm:$0xff]  ;;  %v174_v6 = vld [vmem:[%s168_s30 + $0x20] sm:$0xff]  ;;  %v175_v7 = vld [vmem:[%s168_s30 + $0x28] sm:$0xff]  ;;  %p394_p13 = pneg %p393_p12 }
  0x1a   : > { %v172_v8 = vld [vmem:[%s168_s30 + $0x10] sm:$0xff]  ;;  %v173_v9 = vld [vmem:[%s168_s30 + $0x18] sm:$0xff]  ;;  %v170_v10 = vld [vmem:[%s168_s30] sm:$0xff] }
  0x1b   : > { %209 = vmatpush.msra.mxu0 %v176_v4  ;;  %229 = vmatpush.msra.mxu1 %v177_v5  ;;  %v171_v11 = vld [vmem:[%s168_s30 + $0x8] sm:$0xff]  ;;  %p399_p3 = pnand %p398_p2, %p394_p13 }
  0x1d   : > { %210 = vmatpush.msra.mxu0 %v174_v6  ;;  %230 = vmatpush.msra.mxu1 %v175_v7 }
  0x1f   : > { %211 = vmatpush.msra.mxu0 %v172_v8  ;;  %231 = vmatpush.msra.mxu1 %v173_v9 }
  0x21   : > { %212 = vmatpush.msra.mxu0 %v170_v10  ;;  %232 = vmatpush.msra.mxu1 %v171_v11 }
  0x22   : > { %324 = vmatmul.msk.f32.vlgmr.msra.gmra.mxu0 %vm186_vm1, %v169_v12  ;;  %326 = vmatmul.msk.f32.vlgmr.msra.gmra.mxu1 %vm186_vm1, %v169_v12 }
  0x87   : > { %v184_v13 = vpop.permute.xlu0 %183 }
  0x9f   : > { %v214_v14 = vpop.f32.mrf.mxu0  ;;  %v234_v15 = vpop.f32.mrf.mxu1 }
  0xa0   : > { %v215_v16 = vadd.f32 %v214_v14, %v184_v13  ;;  %v235_v17 = vadd.f32 %v234_v15, %v184_v13 }
  0xa2   : > { %v237_v18 = vmax.f32 %v215_v16, 0.0  ;;  %v238_v19 = vmax.f32 %v235_v17, 0.0 }
  0xa4   : > { %239 = vst [vmem:[%s163_s17] sm:$0xff] %v237_v18 }
  0xa5   : > { %240 = vst [vmem:[%s163_s17 + $0x8] sm:$0xff] %v238_v19 }
  0xa6   : > { %402 = shalt.err (!%p399_p3)
}
  0xa7   : > { %334 = dma.vmem_to_hbm [thread:$0]  (%p498_p5), %s256_s19, 256, %s258_s20, %s242_s16  }
  0xa8 PF: > { %p340_p4 = scmp.ge.s32.totalorder %s437_s15, 2  ;;  %s269_s4 = sand.u32 1, %s425_s12  }
  0xa9   : > { %s270_s5 = scalar_lea.sflag [#allocation3], %s269_s4 }
  0xaa   : > { %p337_p7 = pnand %p340_p4, %p502_p6 }
  0xac   : > { %p338_p8 = pneg %p337_p7 }
  0xae   : > { %420 = dma.done.wait (%p338_p8), %s270_s5, 256  }
  0xaf   : > { %422 = vsyncadd (%p338_p8), %s270_s5, 4294967040  ;;  %p13_p9 = scmp.ge.s32.totalorder %s485_s18, 4   ;;  %s557_s12 = smov %s429_s13 }
  0xb0   : > { %s558_s13 = smov %s433_s14  ;;  %s559_s14 = smov %s496_s21 }
  0xb1   : > { %s560_s15 = smov %s485_s18  ;;  %15 = sbr.rel (!%p13_p9) target bundleno = 3 (0x3), region = 67 }
  0xb6   :  { %276 = vsyncpa [#allocation3], 1 }
  0xb7   :  { %278 = vsyncpa [#allocation3 + $0x1], 1 }

</bundles_post_ra>
